<compile_context>
chip_gen: v6e
topology: v6e:2x2x1
jax: 0.10.0
libtpu: 0.0.40
codegen_flags: <defaults>
</compile_context>

<pallas_src>
import functools

import jax
import jax.numpy as jnp
from jax import lax
from jax.experimental import pallas as pl
from jax.experimental.pallas import tpu as pltpu

NEG_INF = -1e30


def _round_up(x, m):
    return (x + m - 1) // m * m


def _choose_tile(npad):
    # Destination-row tile. Small graphs: one tile. Large graphs: 256 rows keeps
    # (2x double-buffered bf16 adj tile + the f32 e/p temporaries) comfortably
    # inside v7x's 64 MiB/TC VMEM while staying near the HBM roofline.
    if npad <= 512:
        return npad
    return 256


# ---------------------------------------------------------------------------
# Kernel 1: shared linear projection + attention-coefficient scores.
#   xw      = x @ W                                        [TM, H*C]
#   s_dst   = xw @ A_dst_blk      (col h = <xw_h, a_dst_h>) [TM, H]
#   s_srcT  = A_srcT_blk @ xw^T   (row h = <xw_h, a_src_h>) [H, TM]
# A_dst_blk / A_srcT_blk are block matrices built on the host, so the 2*heads
# tiny per-head dots of the previous version collapse into two real matmuls,
# and the src scores come out lane-major (no transpose needed later).
# ---------------------------------------------------------------------------
def _project_kernel(x_ref, w_ref, adst_ref, asrcT_ref,
                    xw_ref, sdst_ref, ssrcT_ref):
    xw = jnp.dot(x_ref[...], w_ref[...], preferred_element_type=jnp.float32)
    xw_ref[...] = xw
    sdst_ref[...] = jnp.dot(xw, adst_ref[...],
                            preferred_element_type=jnp.float32)
    ssrcT_ref[...] = lax.dot_general(
        asrcT_ref[...], xw, (((1,), (1,)), ((), ())),
        preferred_element_type=jnp.float32)


# ---------------------------------------------------------------------------
# Kernel 2: masked edge softmax + aggregation for one tile of dst rows.
# ---------------------------------------------------------------------------
def _attend_kernel(mask_ref, sdst_ref, ssrcT_ref, xw_ref, b_ref, o_ref,
                   *, heads, out_ch, apply_relu):
    mask = mask_ref[...].astype(jnp.float32)      # [TM, Npad] additive bias
    sdst = sdst_ref[...]                          # [TM, H]
    ssrcT = ssrcT_ref[...]                        # [H, Npad]
    xw = xw_ref[...]                              # [Npad, H*C]

    head_outs = []
    for h in range(heads):
        e = sdst[:, h:h + 1] + ssrcT[h:h + 1, :]          # [TM, Npad]
        e = jnp.where(e > 0, e, 0.2 * e)                  # LeakyReLU(0.2)
        e = e + mask                                      # -1e30 on non-edges
        m = jnp.max(e, axis=-1, keepdims=True)
        p = jnp.exp(e - m)                                # unnormalized weights
        inv = pl.reciprocal(jnp.sum(p, axis=-1, keepdims=True), approx=True)
        agg = jnp.dot(p, xw[:, h * out_ch:(h + 1) * out_ch],
                      preferred_element_type=jnp.float32)  # [TM, C]
        head_outs.append(agg * inv)       # normalize on [TM, C], not [TM, N]

    # Single lane-contiguous [TM, H*C] store (H*C=32 < 128 lanes; padding the
    # feature dim to 128 would trade 4x store traffic — not worth it here).
    out = jnp.concatenate(head_outs, axis=-1) + b_ref[...]
    if apply_relu:
        out = jnp.maximum(out, 0.0)
    o_ref[...] = out.astype(o_ref.dtype)


def gat_layer(x_pad, mask_bias, w, a_dst_blk, a_srcT_blk, bias,
              *, heads, out_ch, apply_relu, tile_m):
    npad, fin = x_pad.shape
    hc = heads * out_ch
    grid = (npad // tile_m,)
    cparams = pltpu.CompilerParams(
        dimension_semantics=("parallel",),
        vmem_limit_bytes=64 * 1024 * 1024)

    xw, sdst, ssrcT = pl.pallas_call(
        _project_kernel,
        grid=grid,
        in_specs=[
            pl.BlockSpec((tile_m, fin), lambda i: (i, 0)),
            pl.BlockSpec((fin, hc), lambda i: (0, 0)),
            pl.BlockSpec((hc, heads), lambda i: (0, 0)),
            pl.BlockSpec((heads, hc), lambda i: (0, 0)),
        ],
        out_specs=[
            pl.BlockSpec((tile_m, hc), lambda i: (i, 0)),
            pl.BlockSpec((tile_m, heads), lambda i: (i, 0)),
            pl.BlockSpec((heads, tile_m), lambda i: (0, i)),
        ],
        out_shape=[
            jax.ShapeDtypeStruct((npad, hc), jnp.float32),
            jax.ShapeDtypeStruct((npad, heads), jnp.float32),
            jax.ShapeDtypeStruct((heads, npad), jnp.float32),
        ],
        compiler_params=cparams,
    )(x_pad, w, a_dst_blk, a_srcT_blk)

    kernel = functools.partial(_attend_kernel, heads=heads, out_ch=out_ch,
                               apply_relu=apply_relu)
    out = pl.pallas_call(
        kernel,
        grid=grid,
        in_specs=[
            pl.BlockSpec((tile_m, npad), lambda i: (i, 0)),   # bf16 mask tile
            pl.BlockSpec((tile_m, heads), lambda i: (i, 0)),  # dst scores tile
            pl.BlockSpec((heads, npad), lambda i: (0, 0)),    # src scores (all)
            pl.BlockSpec((npad, hc), lambda i: (0, 0)),       # xw (all sources)
            pl.BlockSpec((1, hc), lambda i: (0, 0)),          # bias
        ],
        out_specs=pl.BlockSpec((tile_m, hc), lambda i: (i, 0)),
        out_shape=jax.ShapeDtypeStruct((npad, hc), jnp.float32),
        compiler_params=cparams,
    )(mask_bias, sdst, ssrcT, xw, bias)
    return out


def init_gat_params(key, in_dim, out_ch, heads):
    k1, k2, k3 = jax.random.split(key, 3)
    hc = heads * out_ch
    scale_w = (2.0 / (in_dim + hc)) ** 0.5
    w = jax.random.normal(k1, (in_dim, hc), jnp.float32) * scale_w
    att_src = jax.random.normal(k2, (heads, out_ch), jnp.float32) * 0.1
    att_dst = jax.random.normal(k3, (heads, out_ch), jnp.float32) * 0.1
    bias = jnp.zeros((1, hc), jnp.float32)

    # Block matrices so the per-head <xw_h, a> scores come out of one matmul:
    #   (xw @ a_dst_blk)[:, h]   = xw_h . att_dst[h]
    #   (a_srcT_blk @ xw^T)[h,:] = xw_h . att_src[h]
    a_dst_blk = jnp.zeros((hc, heads), jnp.float32)
    a_srcT_blk = jnp.zeros((heads, hc), jnp.float32)
    for h in range(heads):
        a_dst_blk = a_dst_blk.at[h * out_ch:(h + 1) * out_ch, h].set(att_dst[h])
        a_srcT_blk = a_srcT_blk.at[h, h * out_ch:(h + 1) * out_ch].set(att_src[h])
    return w, a_dst_blk, a_srcT_blk, bias


def gat_encoder(x, adj, params1, params2, *, heads, hidden):
    n, fin = x.shape
    npad = _round_up(n, 8)
    tile_m = _choose_tile(npad)
    npad = _round_up(npad, tile_m)

    x_pad = jnp.zeros((npad, fin), x.dtype).at[:n, :].set(x)
    adj_pad = jnp.zeros((npad, npad), jnp.float32).at[:n, :n].set(adj)
    # Additive softmax mask (0 on edges/self-loops, -1e30 elsewhere) in bf16:
    # built once on the host, shared by both layers.
    mask_bias = jnp.where(adj_pad > 0, 0.0, NEG_INF).astype(jnp.bfloat16)

    h1 = gat_layer(x_pad, mask_bias, *params1, heads=heads, out_ch=hidden,
                   apply_relu=True, tile_m=tile_m)
    out = gat_layer(h1, mask_bias, *params2, heads=heads, out_ch=hidden,
                    apply_relu=False, tile_m=tile_m)
    return out[:n]


if __name__ == "__main__":
    N, IN_DIM, HIDDEN, HEADS = 5, 10, 8, 4

    key = jax.random.PRNGKey(0)
    kx, kp1, kp2 = jax.random.split(key, 3)

    x = jax.random.normal(kx, (N, IN_DIM), jnp.float32)

    # edge_index = [[0,1,2,3,4],[1,2,3,4,0]]  (src, dst) -> dense mask + self loops
    edge_index = jnp.array([[0, 1, 2, 3, 4], [1, 2, 3, 4, 0]], dtype=jnp.int32)
    src, dst = edge_index[0], edge_index[1]
    adj = jnp.zeros((N, N), jnp.float32).at[dst, src].set(1.0)
    adj = jnp.maximum(adj, jnp.eye(N, dtype=jnp.float32))

    params1 = init_gat_params(kp1, IN_DIM, HIDDEN, HEADS)          # conv1: 10 -> 8 x4
    params2 = init_gat_params(kp2, HIDDEN * HEADS, HIDDEN, HEADS)  # conv2: 32 -> 8 x4

    out = gat_encoder(x, adj, params1, params2, heads=HEADS, hidden=HIDDEN)
    jax.block_until_ready(out)
    assert out.shape == (N, HEADS * HIDDEN)
    assert bool(jnp.all(jnp.isfinite(out)))
    print("KERNEL_OK")
</pallas_src>

<mosaic_0001>
module attributes {stable_mosaic.version = 11 : i64} {
  func.func @_project_kernel(%arg0: i32, %arg1: memref<8x10xf32, #tpu.memory_space<vmem>>, %arg2: memref<10x32xf32, #tpu.memory_space<vmem>>, %arg3: memref<32x4xf32, #tpu.memory_space<vmem>>, %arg4: memref<4x32xf32, #tpu.memory_space<vmem>>, %arg5: memref<8x32xf32, #tpu.memory_space<vmem>>, %arg6: memref<8x4xf32, #tpu.memory_space<vmem>>, %arg7: memref<4x8xf32, #tpu.memory_space<vmem>>) attributes {dimension_semantics = [#tpu.dimension_semantics<parallel>], iteration_bounds = array<i64: 1>, scalar_prefetch = 0 : i64, scratch_operands = 0 : i64, tpu.core_type = #tpu.core_type<tc>, window_params = [{transform_indices = @transform_0, window_bounds = array<i64: 8, 10>}, {pipeline_mode = #tpu.pipeline_mode<synchronous>, transform_indices = @transform_1, window_bounds = array<i64: 10, 32>}, {pipeline_mode = #tpu.pipeline_mode<synchronous>, transform_indices = @transform_2, window_bounds = array<i64: 32, 4>}, {pipeline_mode = #tpu.pipeline_mode<synchronous>, transform_indices = @transform_3, window_bounds = array<i64: 4, 32>}, {transform_indices = @transform_4, window_bounds = array<i64: 8, 32>}, {transform_indices = @transform_5, window_bounds = array<i64: 8, 4>}, {transform_indices = @transform_6, window_bounds = array<i64: 4, 8>}]} {
    %c0 = arith.constant 0 : index
    %c0_0 = arith.constant 0 : index
    %0 = vector.load %arg1[%c0, %c0_0] : memref<8x10xf32, #tpu.memory_space<vmem>>, vector<8x10xf32>
    %c0_1 = arith.constant 0 : index
    %c0_2 = arith.constant 0 : index
    %1 = vector.load %arg2[%c0_1, %c0_2] : memref<10x32xf32, #tpu.memory_space<vmem>>, vector<10x32xf32>
    %cst = arith.constant dense<0.000000e+00> : vector<8x32xf32>
    %2 = tpu.matmul %0, %1, %cst {dimension_numbers = #tpu.dot_dimension_numbers<[1], [0], [0], [1], [0, 0, 1, 1], [], []>} : vector<8x10xf32>, vector<10x32xf32>, vector<8x32xf32> -> vector<8x32xf32>
    %c0_3 = arith.constant 0 : index
    %c0_4 = arith.constant 0 : index
    %3 = vector.load %arg5[%c0_3, %c0_4] : memref<8x32xf32, #tpu.memory_space<vmem>>, vector<8x32xf32>
    tpu.vector_store %arg5[%c0_3, %c0_4], %2 {strides = array<i32>} : memref<8x32xf32, #tpu.memory_space<vmem>>, vector<8x32xf32>,
    %c0_5 = arith.constant 0 : index
    %c0_6 = arith.constant 0 : index
    %4 = vector.load %arg3[%c0_5, %c0_6] : memref<32x4xf32, #tpu.memory_space<vmem>>, vector<32x4xf32>
    %cst_7 = arith.constant dense<0.000000e+00> : vector<8x4xf32>
    %5 = tpu.matmul %2, %4, %cst_7 {dimension_numbers = #tpu.dot_dimension_numbers<[1], [0], [0], [1], [0, 0, 1, 1], [], []>} : vector<8x32xf32>, vector<32x4xf32>, vector<8x4xf32> -> vector<8x4xf32>
    %c0_8 = arith.constant 0 : index
    %c0_9 = arith.constant 0 : index
    %6 = vector.load %arg6[%c0_8, %c0_9] : memref<8x4xf32, #tpu.memory_space<vmem>>, vector<8x4xf32>
    tpu.vector_store %arg6[%c0_8, %c0_9], %5 {strides = array<i32>} : memref<8x4xf32, #tpu.memory_space<vmem>>, vector<8x4xf32>,
    %c0_10 = arith.constant 0 : index
    %c0_11 = arith.constant 0 : index
    %7 = vector.load %arg4[%c0_10, %c0_11] : memref<4x32xf32, #tpu.memory_space<vmem>>, vector<4x32xf32>
    %cst_12 = arith.constant dense<0.000000e+00> : vector<4x8xf32>
    %8 = tpu.matmul %7, %2, %cst_12 {dimension_numbers = #tpu.dot_dimension_numbers<[1], [1], [0], [0], [0, 0, 1, 0], [], []>} : vector<4x32xf32>, vector<8x32xf32>, vector<4x8xf32> -> vector<4x8xf32>
    %c0_13 = arith.constant 0 : index
    %c0_14 = arith.constant 0 : index
    %9 = vector.load %arg7[%c0_13, %c0_14] : memref<4x8xf32, #tpu.memory_space<vmem>>, vector<4x8xf32>
    tpu.vector_store %arg7[%c0_13, %c0_14], %8 {strides = array<i32>} : memref<4x8xf32, #tpu.memory_space<vmem>>, vector<4x8xf32>,
    return
  }
  func.func @transform_0(%arg0: i32) -> (i32, i32) {
    %c0_i32 = arith.constant 0 : i32
    %c0_i32_0 = arith.constant 0 : i32
    return %arg0, %c0_i32 : i32, i32
  }
  func.func @transform_1(%arg0: i32) -> (i32, i32) {
    %c0_i32 = arith.constant 0 : i32
    %c0_i32_0 = arith.constant 0 : i32
    %c0_i32_1 = arith.constant 0 : i32
    return %c0_i32, %c0_i32_0 : i32, i32
  }
  func.func @transform_2(%arg0: i32) -> (i32, i32) {
    %c0_i32 = arith.constant 0 : i32
    %c0_i32_0 = arith.constant 0 : i32
    %c0_i32_1 = arith.constant 0 : i32
    return %c0_i32, %c0_i32_0 : i32, i32
  }
  func.func @transform_3(%arg0: i32) -> (i32, i32) {
    %c0_i32 = arith.constant 0 : i32
    %c0_i32_0 = arith.constant 0 : i32
    %c0_i32_1 = arith.constant 0 : i32
    return %c0_i32, %c0_i32_0 : i32, i32
  }
  func.func @transform_4(%arg0: i32) -> (i32, i32) {
    %c0_i32 = arith.constant 0 : i32
    %c0_i32_0 = arith.constant 0 : i32
    return %arg0, %c0_i32 : i32, i32
  }
  func.func @transform_5(%arg0: i32) -> (i32, i32) {
    %c0_i32 = arith.constant 0 : i32
    %c0_i32_0 = arith.constant 0 : i32
    return %arg0, %c0_i32 : i32, i32
  }
  func.func @transform_6(%arg0: i32) -> (i32, i32) {
    %c0_i32 = arith.constant 0 : i32
    %c0_i32_0 = arith.constant 0 : i32
    return %c0_i32, %arg0 : i32, i32
  }
}

</mosaic_0001>

<bundles_post_ra>
// kernel: tpu_custom_call.1
= control target key start
LH: loop header
LB: loop body
LE: loop exit
PB: predicated region body
PF: predicated region fallthrough
CT: control target
= control target key end

     0   :  { %12 = vsyncpa [#allocation3], 0  ;;  %vm29_vm0 = vcmask 1041408   ;;  %v378_v1 = vmov 0.0   ;;  %vm379_vm1 = vmmov 0   ;;  %vm25_vm2 = vcmask 80896   ;;  %s453_s0 = inlined_call_operand.vmem [shape: f32[8,10], index: 0, kind: input, shape index: {}]   ;;  %s454_s1 = inlined_call_operand.vmem [shape: f32[10,32], index: 1, kind: input, shape index: {}]   ;;  %s455_s2 = inlined_call_operand.vmem [shape: f32[32,4], index: 2, kind: input, shape index: {}]   ;;  %s456_s3 = inlined_call_operand.vmem [shape: f32[4,32], index: 3, kind: input, shape index: {}]   ;;  %s457_s4 = inlined_call_operand.hbm [shape: f32[8,32], index: 4, kind: output, shape index: {0}]   ;;  %s458_s5 = inlined_call_operand.vmem [shape: f32[8,4], index: 5, kind: output, shape index: {1}]   ;;  %s459_s6 = inlined_call_operand.hbm [shape: f32[4,8], index: 6, kind: output, shape index: {2}]  }
   0x1   :  { %v24_v0 = vld [vmem:[%s454_s1 + $0x8] sm:$0x3]  ;;  %307 = vmatprep.subr.mxu0 %v378_v1  ;;  %v23_v2 = vld [vmem:[%s454_s1] sm:$0xff]  ;;  %311 = vmatprep.mubr.msk.f32.mxu0 %vm379_vm1, %v378_v1  ;;  %v108_v3 = vld [vmem:[%s455_s2 + $0x18] sm:$0xff] }
   0x2   :  { %308 = vmatpush3.msk.msra.mxu0 %vm29_vm0, %v24_v0  ;;  %v22_v4 = vld [vmem:[%s453_s0] sm:$0xff]  ;;  %314 = vmatprep.subr.mxu1 %v378_v1  ;;  %v107_v5 = vld [vmem:[%s455_s2 + $0x10] sm:$0xff] }
   0x3   :  { %13 = vsyncpa [#allocation5], 0  ;;  %309 = vmatprep.subr.mxu0 %v378_v1  ;;  %315 = vmatpush3.msra.mxu1 %v108_v3  ;;  %v106_v6 = vld [vmem:[%s455_s2 + $0x8] sm:$0xff]  ;;  %v105_v7 = vld [vmem:[%s455_s2] sm:$0xff]  ;;  %vm103_vm3 = vcmask 261120   ;;  %s380_s11 = smov [#allocation2]  }
   0x4   :  { %310 = vmatpush3.msra.mxu0 %v23_v2  ;;  %316 = vmatprep.subr.mxu1 %v378_v1  ;;  %v184_v9 = vld [vmem:[%s456_s3] sm:$0xf]  ;;  %s266_s12 = sshll.u32 %s380_s11, 4  ;;  %s267_s12 = int_to_ptr.vmem [resolvable:$true] %s266_s12 }
   0x5   :  { %312 = vmatmul.mubr.msk.f32.vlgmr.msra.gmra.mxu0 %vm25_vm2, %v22_v4  ;;  %317 = vmatpush3.msra.mxu1 %v107_v5  ;;  %s334_s13 = scalar_lea.vmem %s267_s12, 128  ;;  %p339_p1 = scmp.lt.s32.totalorder %s267_s12, %s267_s12 }
   0x6   :  { %318 = vmatprep.subr.mxu1 %v378_v1  ;;  %322 = vmatprep.mubr.msk.f32.mxu1 %vm379_vm1, %v378_v1  ;;  %p335_p0 = scmp.ne.s32.totalorder %s267_s12, %s334_s13  ;;  %p340_p2 = scmp.lt.s32.totalorder %s334_s13, %s334_s13 }
   0x7   :  { %319 = vmatpush3.msra.mxu1 %v106_v6  ;;  %325 = vmatprep.subr.mxu0 %v378_v1 }
   0x8   :  { %320 = vmatprep.subr.mxu1 %v378_v1  ;;  %327 = vmatprep.mubr.msk.f32.mxu0 %vm379_vm1, %v378_v1  ;;  %p341_p3 = por %p340_p2, %p339_p1 }
   0x9   :  { %321 = vmatpush3.msra.mxu1 %v105_v7 }
   0xa   :  { %p342_p4 = pnand %p341_p3, %p335_p0 }
  0xc5   :  { %v99_v8 = vpop.f32.mrf.mxu0 }
  0xc6   :  { %323 = vmatmul.mubr.msk.f32.vlgmr.msra.gmra.mxu1 %vm103_vm3, %v99_v8  ;;  %104 = vst.msk [vmem:[#allocation2] sm:$0xff] %vm103_vm3, %v99_v8  ;;  %326 = vmatpush3.xpose.msk.msra.mxu0 %vm103_vm3, %v99_v8 }
  0xc7   :  { %v313_v10 = vpop.f32.mrf.mxu0 }
  0xc9   :  { %328 = vmatmul.mubr.msk.f32.vlgmr.msra.gmra.mxu0 %vm103_vm3, %v184_v9 }
  0xca   :  { %345 = shalt.err (!%p342_p4)
}
  0xcb   :  { %269 = dma.vmem_to_hbm [thread:$0]  %s267_s12, 128, %s457_s4, [#allocation3]   ;;  %vm182_vm4 = vcmask 31744   ;;  %vm258_vm5 = vcmask 60416  }
  0xcc   :  { %s381_s15 = smov [#allocation4]  }
  0xcd   :  { %s278_s16 = sshll.u32 %s381_s15, 4  ;;  %s279_s16 = int_to_ptr.vmem [resolvable:$true] %s278_s16 }
  0xce   :  { %s354_s18 = scalar_lea.vmem %s279_s16, 64  ;;  %p359_p6 = scmp.lt.s32.totalorder %s279_s16, %s279_s16 }
  0xcf   :  { %p355_p5 = scmp.ne.s32.totalorder %s279_s16, %s354_s18  ;;  %p360_p7 = scmp.lt.s32.totalorder %s354_s18, %s354_s18 }
  0xd1   :  { %p361_p8 = por %p360_p7, %p359_p6 }
  0xd3   :  { %p362_p9 = pnand %p361_p8, %p355_p5 }
 0x186   :  { %v178_v11 = vpop.f32.mrf.mxu1 }
 0x187   :  { %183 = vst.msk [vmem:[%s458_s5] sm:$0xff] %vm182_vm4, %v178_v11 }
 0x188   :  { %v324_v12 = vpop.f32.mrf.mxu1 }
 0x189   :  { %v254_v13 = vpop.f32.mrf.mxu0 }
 0x18a   :  { %259 = vst.msk [vmem:[#allocation4] sm:$0xf] %vm258_vm5, %v254_v13 }
 0x18b   :  { %v329_v14 = vpop.f32.mrf.mxu0 }
 0x18c   :  { %365 = shalt.err (!%p362_p9)
}
 0x18d   :  { %281 = dma.vmem_to_hbm [thread:$0]  %s279_s16, 64, %s459_s6, [#allocation5]  }
 0x18e   :  { %374 = dma.done.wait [#allocation3], 128  }
 0x18f   :  { %375 = vsyncadd [#allocation3], 4294967168 }
 0x190   :  { %376 = dma.done.wait [#allocation5], 64  }
 0x191   :  { %377 = vsyncadd [#allocation5], 4294967232 }
 0x192   :  { %290 = vsyncpa [#allocation3], 1 }
 0x193   :  { %291 = vsyncpa [#allocation5], 1 }

</bundles_post_ra>
